<compile_context>
chip_gen: v5e
topology: v5e:2x2
jax: 0.10.0
libtpu: 0.0.40
codegen_flags: <defaults>
</compile_context>

<pallas_src>
import functools

import numpy as np
import jax
import jax.numpy as jnp
from jax.experimental import pallas as pl
from jax.experimental.pallas import tpu as pltpu


def double_conv_kernel(x_ref, b1_ref, s1_ref, t1_ref, b2_ref, s2_ref, t2_ref,
                       o_ref, *, H):
    # x_ref : (TB*H, W*Cin)    unpadded rows of a batch tile (channels fastest)
    # b1_ref: (3*W*Cin,  W*Cout)  dy-stacked banded weights for conv1 (bf16)
    # b2_ref: (3*W*Cout, W*Cout)  dy-stacked banded weights for conv2 (bf16)
    # s*/t* : (1, W*Cout)      folded BN scale / bias (f32, tiled per column)
    # o_ref : (TB*H, W*Cout)
    M = x_ref.shape[0]

    def conv3x3(y, w_ref):
        # y: (M, K) bf16. Builds the (M, 3K) dy-window operand in registers
        # and issues ONE wide-K MXU matmul with f32 accumulation.
        K = y.shape[-1]
        zrow = jnp.zeros((1, K), jnp.bfloat16)
        up = jnp.concatenate([zrow, y[:M - 1, :]], axis=0)   # dy = 0 tap rows
        dn = jnp.concatenate([y[1:, :], zrow], axis=0)       # dy = 2 tap rows
        # Zero the shifted rows that crossed an image boundary inside the tile
        # (this implements per-image H zero-padding without an HBM pad copy).
        r = jax.lax.broadcasted_iota(jnp.int32, (M, K), 0)
        up = jnp.where((r % H) == 0, jnp.zeros_like(up), up)
        dn = jnp.where((r % H) == H - 1, jnp.zeros_like(dn), dn)
        cat = jnp.concatenate([up, y, dn], axis=-1)          # (M, 3K)
        return jnp.dot(cat, w_ref[...], preferred_element_type=jnp.float32)

    x = x_ref[...].astype(jnp.bfloat16)
    a1 = conv3x3(x, b1_ref)                                  # conv1 (one matmul)
    y1 = jnp.maximum(a1 * s1_ref[...] + t1_ref[...], 0.0)    # BN1 + ReLU (f32)
    a2 = conv3x3(y1.astype(jnp.bfloat16), b2_ref)            # conv2 (one matmul)
    y2 = jnp.maximum(a2 * s2_ref[...] + t2_ref[...], 0.0)    # BN2 + ReLU (f32)
    o_ref[...] = y2


def _banded_weights(w_np, W):
    """Fold a (Cout, Cin, 3, 3) conv weight (torch OIHW) into a dy-stacked
    (3*W*Cin, W*Cout) banded matrix that encodes the dx taps, width
    zero-padding and channel mixing; dy is the slowest K axis (matches the
    [up | center | down] lane-concat order in the kernel)."""
    Cout, Cin = w_np.shape[0], w_np.shape[1]
    B = np.zeros((3, W * Cin, W * Cout), np.float32)
    for dy in range(3):
        for dx in range(3):
            wt = w_np[:, :, dy, dx].T            # (Cin, Cout)
            for wc in range(W):
                wq = wc + dx - 1                 # input column for this tap
                if 0 <= wq < W:
                    B[dy, wq * Cin:(wq + 1) * Cin,
                      wc * Cout:(wc + 1) * Cout] = wt
    return B.reshape(3 * W * Cin, W * Cout)


def _pick_batch_tile(N, H, target_rows=256):
    """Smallest divisor TB of N with TB*H >= target_rows (fills MXU M rows on
    v6e/v7x); if no divisor reaches it, take the whole batch (amortizes the
    per-grid-step overhead, which dominates at small N)."""
    for tb in range(1, N + 1):
        if N % tb == 0 and tb * H >= target_rows:
            return tb
    return N


def double_conv(x_nchw, w1, g1, be1, rm1, rv1, w2, g2, be2, rm2, rv2, eps=1e-5):
    N, Cin, H, W = x_nchw.shape
    Cout = w1.shape[0]

    # glue: NCHW -> NHWC -> (N*H, W*Cin); H padding is handled in-kernel, so no
    # padded copy of the input is materialized in HBM.
    x = jnp.transpose(x_nchw, (0, 2, 3, 1)).reshape(N * H, W * Cin)
    x = x.astype(jnp.float32)

    # dy-stacked banded weights as bf16 MXU operands.
    b1 = jnp.asarray(_banded_weights(np.asarray(w1), W), jnp.bfloat16)
    b2 = jnp.asarray(_banded_weights(np.asarray(w2), W), jnp.bfloat16)
    weight_bytes = 2 * (b1.size + b2.size)
    if weight_bytes > 48 * 1024 * 1024:   # VMEM guard (v7x: 64 MiB per TC)
        raise NotImplementedError(
            "banded conv weights exceed the VMEM budget; tile the W*Cout axis")

    # Fold BN (inference mode) into per-channel scale/bias, tiled across width.
    sc1 = g1 / jnp.sqrt(rv1 + eps)
    bi1 = be1 - rm1 * sc1
    sc2 = g2 / jnp.sqrt(rv2 + eps)
    bi2 = be2 - rm2 * sc2
    s1 = jnp.tile(sc1, W).reshape(1, W * Cout).astype(jnp.float32)
    t1 = jnp.tile(bi1, W).reshape(1, W * Cout).astype(jnp.float32)
    s2 = jnp.tile(sc2, W).reshape(1, W * Cout).astype(jnp.float32)
    t2 = jnp.tile(bi2, W).reshape(1, W * Cout).astype(jnp.float32)

    TB = _pick_batch_tile(N, H)
    kernel = functools.partial(double_conv_kernel, H=H)

    out = pl.pallas_call(
        kernel,
        out_shape=jax.ShapeDtypeStruct((N * H, W * Cout), jnp.float32),
        grid_spec=pltpu.PrefetchScalarGridSpec(
            num_scalar_prefetch=0,
            grid=(N // TB,),
            in_specs=[
                pl.BlockSpec((TB * H, W * Cin), lambda n: (n, 0)),
                pl.BlockSpec((3 * W * Cin, W * Cout), lambda n: (0, 0)),
                pl.BlockSpec((1, W * Cout), lambda n: (0, 0)),
                pl.BlockSpec((1, W * Cout), lambda n: (0, 0)),
                pl.BlockSpec((3 * W * Cout, W * Cout), lambda n: (0, 0)),
                pl.BlockSpec((1, W * Cout), lambda n: (0, 0)),
                pl.BlockSpec((1, W * Cout), lambda n: (0, 0)),
            ],
            out_specs=pl.BlockSpec((TB * H, W * Cout), lambda n: (n, 0)),
        ),
        compiler_params=pltpu.CompilerParams(
            dimension_semantics=("parallel",)),
    )(x, b1, s1, t1, b2, s2, t2)

    # glue: (N*H, W*Cout) -> NHWC -> NCHW
    return jnp.transpose(out.reshape(N, H, W, Cout), (0, 3, 1, 2))


def ref_double_conv(x, w1, g1, be1, rm1, rv1, w2, g2, be2, rm2, rv2,
                    eps=1e-5, conv_dtype=jnp.float32):
    def conv(xx, ww):
        return jax.lax.conv_general_dilated(
            xx.astype(conv_dtype), ww.astype(conv_dtype), (1, 1),
            ((1, 1), (1, 1)), dimension_numbers=("NCHW", "OIHW", "NCHW"),
            preferred_element_type=jnp.float32)

    def bn(xx, g, b, m, v):
        s = g / jnp.sqrt(v + eps)
        return xx * s[None, :, None, None] + (b - m * s)[None, :, None, None]

    y = jax.nn.relu(bn(conv(x, w1), g1, be1, rm1, rv1))
    y = jax.nn.relu(bn(conv(y, w2), g2, be2, rm2, rv2))
    return y


if __name__ == "__main__":
    N, Cin, Cout, H, W = 2, 4, 8, 16, 16

    key = jax.random.PRNGKey(0)
    ks = jax.random.split(key, 11)
    x = jax.random.normal(ks[0], (N, Cin, H, W), jnp.float32)

    w1 = jax.random.normal(ks[1], (Cout, Cin, 3, 3), jnp.float32) * 0.2
    g1 = jax.random.uniform(ks[2], (Cout,), jnp.float32, 0.5, 1.5)
    be1 = jax.random.normal(ks[3], (Cout,), jnp.float32) * 0.1
    rm1 = jax.random.normal(ks[4], (Cout,), jnp.float32) * 0.1
    rv1 = jax.random.uniform(ks[5], (Cout,), jnp.float32, 0.5, 1.5)

    w2 = jax.random.normal(ks[6], (Cout, Cout, 3, 3), jnp.float32) * 0.2
    g2 = jax.random.uniform(ks[7], (Cout,), jnp.float32, 0.5, 1.5)
    be2 = jax.random.normal(ks[8], (Cout,), jnp.float32) * 0.1
    rm2 = jax.random.normal(ks[9], (Cout,), jnp.float32) * 0.1
    rv2 = jax.random.uniform(ks[10], (Cout,), jnp.float32, 0.5, 1.5)

    args = (x, w1, g1, be1, rm1, rv1, w2, g2, be2, rm2, rv2)

    out = jax.block_until_ready(double_conv(*args))
    assert out.shape == (N, Cout, H, W), out.shape

    # Check 1 (tight): reference with the same numeric contract as the kernel
    # (bf16 conv operands, f32 accumulation) — verifies the algorithm/banding.
    ref_b = jax.block_until_ready(
        ref_double_conv(*args, conv_dtype=jnp.bfloat16))
    if not jnp.allclose(out, ref_b, rtol=5e-3, atol=5e-3):
        raise AssertionError(
            "mismatch vs bf16-matched reference: max abs err = "
            f"{float(jnp.max(jnp.abs(out - ref_b)))}")

    # Check 2 (sanity): full-f32 reference (original module semantics);
    # tolerance reflects bf16 matmul-operand rounding only.
    ref_f = jax.block_until_ready(
        ref_double_conv(*args, conv_dtype=jnp.float32))
    if not jnp.allclose(out, ref_f, rtol=3e-2, atol=3e-2):
        raise AssertionError(
            "mismatch vs f32 reference: max abs err = "
            f"{float(jnp.max(jnp.abs(out - ref_f)))}")

    print("KERNEL_OK")
</pallas_src>

<mosaic_0001>
module attributes {stable_mosaic.version = 11 : i64} {
  func.func @double_conv_kernel(%arg0: i32, %arg1: memref<32x64xf32, #tpu.memory_space<vmem>>, %arg2: memref<192x128xbf16, #tpu.memory_space<vmem>>, %arg3: memref<1x128xf32, #tpu.memory_space<vmem>>, %arg4: memref<1x128xf32, #tpu.memory_space<vmem>>, %arg5: memref<384x128xbf16, #tpu.memory_space<vmem>>, %arg6: memref<1x128xf32, #tpu.memory_space<vmem>>, %arg7: memref<1x128xf32, #tpu.memory_space<vmem>>, %arg8: memref<32x128xf32, #tpu.memory_space<vmem>>) attributes {dimension_semantics = [#tpu.dimension_semantics<parallel>], iteration_bounds = array<i64: 1>, scalar_prefetch = 0 : i64, scratch_operands = 0 : i64, tpu.core_type = #tpu.core_type<tc>, window_params = [{transform_indices = @transform_0, window_bounds = array<i64: 32, 64>}, {pipeline_mode = #tpu.pipeline_mode<synchronous>, transform_indices = @transform_1, window_bounds = array<i64: 192, 128>}, {pipeline_mode = #tpu.pipeline_mode<synchronous>, transform_indices = @transform_2, window_bounds = array<i64: 1, 128>}, {pipeline_mode = #tpu.pipeline_mode<synchronous>, transform_indices = @transform_3, window_bounds = array<i64: 1, 128>}, {pipeline_mode = #tpu.pipeline_mode<synchronous>, transform_indices = @transform_4, window_bounds = array<i64: 384, 128>}, {pipeline_mode = #tpu.pipeline_mode<synchronous>, transform_indices = @transform_5, window_bounds = array<i64: 1, 128>}, {pipeline_mode = #tpu.pipeline_mode<synchronous>, transform_indices = @transform_6, window_bounds = array<i64: 1, 128>}, {transform_indices = @transform_7, window_bounds = array<i64: 32, 128>}]} {
    %c0 = arith.constant 0 : index
    %c0_0 = arith.constant 0 : index
    %0 = vector.load %arg1[%c0, %c0_0] : memref<32x64xf32, #tpu.memory_space<vmem>>, vector<32x64xf32>
    %1 = arith.truncf %0 : vector<32x64xf32> to vector<32x64xbf16>
    %cst = arith.constant 0.000000e+00 : bf16
    %2 = vector.broadcast %cst : bf16 to vector<1x64xbf16>
    %3 = vector.extract_strided_slice %1 {offsets = [0, 0], sizes = [31, 64], strides = [1, 1]} : vector<32x64xbf16> to vector<31x64xbf16>
    %4 = tpu.concatenate %2, %3 in 0 : vector<1x64xbf16>, vector<31x64xbf16> -> vector<32x64xbf16>
    %5 = vector.extract_strided_slice %1 {offsets = [1, 0], sizes = [31, 64], strides = [1, 1]} : vector<32x64xbf16> to vector<31x64xbf16>
    %6 = tpu.concatenate %5, %2 in 0 : vector<31x64xbf16>, vector<1x64xbf16> -> vector<32x64xbf16>
    %7 = tpu.iota {dimensions = array<i32: 0>} : vector<32x64xi32>
    %c16_i32 = arith.constant 16 : i32
    %c0_i32 = arith.constant 0 : i32
    %8 = arith.cmpi eq, %c16_i32, %c0_i32 : i32
    %c1_i32 = arith.constant 1 : i32
    %9 = arith.select %8, %c1_i32, %c16_i32 : i32
    %10 = vector.broadcast %9 : i32 to vector<32x64xi32>
    %11 = arith.remsi %7, %10 : vector<32x64xi32>
    %c0_i32_1 = arith.constant 0 : i32
    %12 = vector.broadcast %c0_i32_1 : i32 to vector<32x64xi32>
    %13 = arith.cmpi ne, %11, %12 : vector<32x64xi32>
    %c0_i32_2 = arith.constant 0 : i32
    %14 = vector.broadcast %c0_i32_2 : i32 to vector<32x64xi32>
    %15 = arith.cmpi slt, %11, %14 : vector<32x64xi32>
    %c0_i32_3 = arith.constant 0 : i32
    %16 = arith.cmpi slt, %9, %c0_i32_3 : i32
    %17 = vector.broadcast %16 : i1 to vector<32x64xi1>
    %18 = vector.broadcast %17 : vector<32x64xi1> to vector<32x64xi1>
    %19 = arith.xori %15, %18 : vector<32x64xi1>
    %20 = arith.andi %19, %13 : vector<32x64xi1>
    %21 = vector.broadcast %9 : i32 to vector<32x64xi32>
    %22 = arith.addi %11, %21 : vector<32x64xi32>
    %23 = arith.select %20, %22, %11 : vector<32x64xi1>, vector<32x64xi32>
    %c0_i32_4 = arith.constant 0 : i32
    %24 = vector.broadcast %c0_i32_4 : i32 to vector<32x64xi32>
    %25 = arith.cmpi eq, %23, %24 : vector<32x64xi32>
    %cst_5 = arith.constant 0.000000e+00 : bf16
    %26 = vector.broadcast %cst_5 : bf16 to vector<32x64xbf16>
    %27 = arith.select %25, %26, %4 : vector<32x64xi1>, vector<32x64xbf16>
    %c16_i32_6 = arith.constant 16 : i32
    %c0_i32_7 = arith.constant 0 : i32
    %28 = arith.cmpi eq, %c16_i32_6, %c0_i32_7 : i32
    %c1_i32_8 = arith.constant 1 : i32
    %29 = arith.select %28, %c1_i32_8, %c16_i32_6 : i32
    %30 = vector.broadcast %29 : i32 to vector<32x64xi32>
    %31 = arith.remsi %7, %30 : vector<32x64xi32>
    %c0_i32_9 = arith.constant 0 : i32
    %32 = vector.broadcast %c0_i32_9 : i32 to vector<32x64xi32>
    %33 = arith.cmpi ne, %31, %32 : vector<32x64xi32>
    %c0_i32_10 = arith.constant 0 : i32
    %34 = vector.broadcast %c0_i32_10 : i32 to vector<32x64xi32>
    %35 = arith.cmpi slt, %31, %34 : vector<32x64xi32>
    %c0_i32_11 = arith.constant 0 : i32
    %36 = arith.cmpi slt, %29, %c0_i32_11 : i32
    %37 = vector.broadcast %36 : i1 to vector<32x64xi1>
    %38 = vector.broadcast %37 : vector<32x64xi1> to vector<32x64xi1>
    %39 = arith.xori %35, %38 : vector<32x64xi1>
    %40 = arith.andi %39, %33 : vector<32x64xi1>
    %41 = vector.broadcast %29 : i32 to vector<32x64xi32>
    %42 = arith.addi %31, %41 : vector<32x64xi32>
    %43 = arith.select %40, %42, %31 : vector<32x64xi1>, vector<32x64xi32>
    %c15_i32 = arith.constant 15 : i32
    %44 = vector.broadcast %c15_i32 : i32 to vector<32x64xi32>
    %45 = arith.cmpi eq, %43, %44 : vector<32x64xi32>
    %cst_12 = arith.constant 0.000000e+00 : bf16
    %46 = vector.broadcast %cst_12 : bf16 to vector<32x64xbf16>
    %47 = arith.select %45, %46, %6 : vector<32x64xi1>, vector<32x64xbf16>
    %48 = tpu.concatenate %27, %1, %47 in 1 : vector<32x64xbf16>, vector<32x64xbf16>, vector<32x64xbf16> -> vector<32x192xbf16>
    %c0_13 = arith.constant 0 : index
    %c0_14 = arith.constant 0 : index
    %49 = vector.load %arg2[%c0_13, %c0_14] : memref<192x128xbf16, #tpu.memory_space<vmem>>, vector<192x128xbf16>
    %cst_15 = arith.constant dense<0.000000e+00> : vector<32x128xf32>
    %50 = tpu.matmul %48, %49, %cst_15 {dimension_numbers = #tpu.dot_dimension_numbers<[1], [0], [0], [1], [0, 0, 1, 1], [], []>} : vector<32x192xbf16>, vector<192x128xbf16>, vector<32x128xf32> -> vector<32x128xf32>
    %c0_16 = arith.constant 0 : index
    %c0_17 = arith.constant 0 : index
    %51 = vector.load %arg3[%c0_16, %c0_17] : memref<1x128xf32, #tpu.memory_space<vmem>>, vector<1x128xf32>
    %52 = vector.broadcast %51 : vector<1x128xf32> to vector<32x128xf32>
    %53 = arith.mulf %50, %52 : vector<32x128xf32>
    %c0_18 = arith.constant 0 : index
    %c0_19 = arith.constant 0 : index
    %54 = vector.load %arg4[%c0_18, %c0_19] : memref<1x128xf32, #tpu.memory_space<vmem>>, vector<1x128xf32>
    %55 = vector.broadcast %54 : vector<1x128xf32> to vector<32x128xf32>
    %56 = arith.addf %53, %55 : vector<32x128xf32>
    %cst_20 = arith.constant 0.000000e+00 : f32
    %57 = vector.broadcast %cst_20 : f32 to vector<32x128xf32>
    %58 = arith.maximumf %56, %57 : vector<32x128xf32>
    %59 = arith.truncf %58 : vector<32x128xf32> to vector<32x128xbf16>
    %cst_21 = arith.constant 0.000000e+00 : bf16
    %60 = vector.broadcast %cst_21 : bf16 to vector<1x128xbf16>
    %61 = vector.extract_strided_slice %59 {offsets = [0, 0], sizes = [31, 128], strides = [1, 1]} : vector<32x128xbf16> to vector<31x128xbf16>
    %62 = tpu.concatenate %60, %61 in 0 : vector<1x128xbf16>, vector<31x128xbf16> -> vector<32x128xbf16>
    %63 = vector.extract_strided_slice %59 {offsets = [1, 0], sizes = [31, 128], strides = [1, 1]} : vector<32x128xbf16> to vector<31x128xbf16>
    %64 = tpu.concatenate %63, %60 in 0 : vector<31x128xbf16>, vector<1x128xbf16> -> vector<32x128xbf16>
    %65 = tpu.iota {dimensions = array<i32: 0>} : vector<32x128xi32>
    %c16_i32_22 = arith.constant 16 : i32
    %c0_i32_23 = arith.constant 0 : i32
    %66 = arith.cmpi eq, %c16_i32_22, %c0_i32_23 : i32
    %c1_i32_24 = arith.constant 1 : i32
    %67 = arith.select %66, %c1_i32_24, %c16_i32_22 : i32
    %68 = vector.broadcast %67 : i32 to vector<32x128xi32>
    %69 = arith.remsi %65, %68 : vector<32x128xi32>
    %c0_i32_25 = arith.constant 0 : i32
    %70 = vector.broadcast %c0_i32_25 : i32 to vector<32x128xi32>
    %71 = arith.cmpi ne, %69, %70 : vector<32x128xi32>
    %c0_i32_26 = arith.constant 0 : i32
    %72 = vector.broadcast %c0_i32_26 : i32 to vector<32x128xi32>
    %73 = arith.cmpi slt, %69, %72 : vector<32x128xi32>
    %c0_i32_27 = arith.constant 0 : i32
    %74 = arith.cmpi slt, %67, %c0_i32_27 : i32
    %75 = vector.broadcast %74 : i1 to vector<32x128xi1>
    %76 = vector.broadcast %75 : vector<32x128xi1> to vector<32x128xi1>
    %77 = arith.xori %73, %76 : vector<32x128xi1>
    %78 = arith.andi %77, %71 : vector<32x128xi1>
    %79 = vector.broadcast %67 : i32 to vector<32x128xi32>
    %80 = arith.addi %69, %79 : vector<32x128xi32>
    %81 = arith.select %78, %80, %69 : vector<32x128xi1>, vector<32x128xi32>
    %c0_i32_28 = arith.constant 0 : i32
    %82 = vector.broadcast %c0_i32_28 : i32 to vector<32x128xi32>
    %83 = arith.cmpi eq, %81, %82 : vector<32x128xi32>
    %cst_29 = arith.constant 0.000000e+00 : bf16
    %84 = vector.broadcast %cst_29 : bf16 to vector<32x128xbf16>
    %85 = arith.select %83, %84, %62 : vector<32x128xi1>, vector<32x128xbf16>
    %c16_i32_30 = arith.constant 16 : i32
    %c0_i32_31 = arith.constant 0 : i32
    %86 = arith.cmpi eq, %c16_i32_30, %c0_i32_31 : i32
    %c1_i32_32 = arith.constant 1 : i32
    %87 = arith.select %86, %c1_i32_32, %c16_i32_30 : i32
    %88 = vector.broadcast %87 : i32 to vector<32x128xi32>
    %89 = arith.remsi %65, %88 : vector<32x128xi32>
    %c0_i32_33 = arith.constant 0 : i32
    %90 = vector.broadcast %c0_i32_33 : i32 to vector<32x128xi32>
    %91 = arith.cmpi ne, %89, %90 : vector<32x128xi32>
    %c0_i32_34 = arith.constant 0 : i32
    %92 = vector.broadcast %c0_i32_34 : i32 to vector<32x128xi32>
    %93 = arith.cmpi slt, %89, %92 : vector<32x128xi32>
    %c0_i32_35 = arith.constant 0 : i32
    %94 = arith.cmpi slt, %87, %c0_i32_35 : i32
    %95 = vector.broadcast %94 : i1 to vector<32x128xi1>
    %96 = vector.broadcast %95 : vector<32x128xi1> to vector<32x128xi1>
    %97 = arith.xori %93, %96 : vector<32x128xi1>
    %98 = arith.andi %97, %91 : vector<32x128xi1>
    %99 = vector.broadcast %87 : i32 to vector<32x128xi32>
    %100 = arith.addi %89, %99 : vector<32x128xi32>
    %101 = arith.select %98, %100, %89 : vector<32x128xi1>, vector<32x128xi32>
    %c15_i32_36 = arith.constant 15 : i32
    %102 = vector.broadcast %c15_i32_36 : i32 to vector<32x128xi32>
    %103 = arith.cmpi eq, %101, %102 : vector<32x128xi32>
    %cst_37 = arith.constant 0.000000e+00 : bf16
    %104 = vector.broadcast %cst_37 : bf16 to vector<32x128xbf16>
    %105 = arith.select %103, %104, %64 : vector<32x128xi1>, vector<32x128xbf16>
    %106 = tpu.concatenate %85, %59, %105 in 1 : vector<32x128xbf16>, vector<32x128xbf16>, vector<32x128xbf16> -> vector<32x384xbf16>
    %c0_38 = arith.constant 0 : index
    %c0_39 = arith.constant 0 : index
    %107 = vector.load %arg5[%c0_38, %c0_39] : memref<384x128xbf16, #tpu.memory_space<vmem>>, vector<384x128xbf16>
    %cst_40 = arith.constant dense<0.000000e+00> : vector<32x128xf32>
    %108 = tpu.matmul %106, %107, %cst_40 {dimension_numbers = #tpu.dot_dimension_numbers<[1], [0], [0], [1], [0, 0, 1, 1], [], []>} : vector<32x384xbf16>, vector<384x128xbf16>, vector<32x128xf32> -> vector<32x128xf32>
    %c0_41 = arith.constant 0 : index
    %c0_42 = arith.constant 0 : index
    %109 = vector.load %arg6[%c0_41, %c0_42] : memref<1x128xf32, #tpu.memory_space<vmem>>, vector<1x128xf32>
    %110 = vector.broadcast %109 : vector<1x128xf32> to vector<32x128xf32>
    %111 = arith.mulf %108, %110 : vector<32x128xf32>
    %c0_43 = arith.constant 0 : index
    %c0_44 = arith.constant 0 : index
    %112 = vector.load %arg7[%c0_43, %c0_44] : memref<1x128xf32, #tpu.memory_space<vmem>>, vector<1x128xf32>
    %113 = vector.broadcast %112 : vector<1x128xf32> to vector<32x128xf32>
    %114 = arith.addf %111, %113 : vector<32x128xf32>
    %cst_45 = arith.constant 0.000000e+00 : f32
    %115 = vector.broadcast %cst_45 : f32 to vector<32x128xf32>
    %116 = arith.maximumf %114, %115 : vector<32x128xf32>
    %c0_46 = arith.constant 0 : index
    %c0_47 = arith.constant 0 : index
    %117 = vector.load %arg8[%c0_46, %c0_47] : memref<32x128xf32, #tpu.memory_space<vmem>>, vector<32x128xf32>
    tpu.vector_store %arg8[%c0_46, %c0_47], %116 {strides = array<i32>} : memref<32x128xf32, #tpu.memory_space<vmem>>, vector<32x128xf32>,
    return
  }
  func.func @transform_0(%arg0: i32) -> (i32, i32) {
    %c0_i32 = arith.constant 0 : i32
    %c0_i32_0 = arith.constant 0 : i32
    return %arg0, %c0_i32 : i32, i32
  }
  func.func @transform_1(%arg0: i32) -> (i32, i32) {
    %c0_i32 = arith.constant 0 : i32
    %c0_i32_0 = arith.constant 0 : i32
    %c0_i32_1 = arith.constant 0 : i32
    return %c0_i32, %c0_i32_0 : i32, i32
  }
  func.func @transform_2(%arg0: i32) -> (i32, i32) {
    %c0_i32 = arith.constant 0 : i32
    %c0_i32_0 = arith.constant 0 : i32
    %c0_i32_1 = arith.constant 0 : i32
    return %c0_i32, %c0_i32_0 : i32, i32
  }
  func.func @transform_3(%arg0: i32) -> (i32, i32) {
    %c0_i32 = arith.constant 0 : i32
    %c0_i32_0 = arith.constant 0 : i32
    %c0_i32_1 = arith.constant 0 : i32
    return %c0_i32, %c0_i32_0 : i32, i32
  }
  func.func @transform_4(%arg0: i32) -> (i32, i32) {
    %c0_i32 = arith.constant 0 : i32
    %c0_i32_0 = arith.constant 0 : i32
    %c0_i32_1 = arith.constant 0 : i32
    return %c0_i32, %c0_i32_0 : i32, i32
  }
  func.func @transform_5(%arg0: i32) -> (i32, i32) {
    %c0_i32 = arith.constant 0 : i32
    %c0_i32_0 = arith.constant 0 : i32
    %c0_i32_1 = arith.constant 0 : i32
    return %c0_i32, %c0_i32_0 : i32, i32
  }
  func.func @transform_6(%arg0: i32) -> (i32, i32) {
    %c0_i32 = arith.constant 0 : i32
    %c0_i32_0 = arith.constant 0 : i32
    %c0_i32_1 = arith.constant 0 : i32
    return %c0_i32, %c0_i32_0 : i32, i32
  }
  func.func @transform_7(%arg0: i32) -> (i32, i32) {
    %c0_i32 = arith.constant 0 : i32
    %c0_i32_0 = arith.constant 0 : i32
    return %arg0, %c0_i32 : i32, i32
  }
}

</mosaic_0001>

<bundles_post_ra>
// kernel: tpu_custom_call.1
= control target key start
LH: loop header
LB: loop body
LE: loop exit
PB: predicated region body
PF: predicated region fallthrough
CT: control target
= control target key end

     0   :  { %12 = vsyncpa [#allocation3], 0  ;;  %s1270_s0 = inlined_call_operand.hbm [shape: f32[32,64], index: 0, kind: input, shape index: {}]   ;;  %s1271_s1 = inlined_call_operand.hbm [shape: bf16[192,128], index: 1, kind: input, shape index: {}]   ;;  %s1272_s2 = inlined_call_operand.vmem [shape: f32[1,128], index: 2, kind: input, shape index: {}]   ;;  %s1273_s3 = inlined_call_operand.vmem [shape: f32[1,128], index: 3, kind: input, shape index: {}]   ;;  %s1274_s4 = inlined_call_operand.hbm [shape: bf16[384,128], index: 4, kind: input, shape index: {}]   ;;  %s1275_s5 = inlined_call_operand.vmem [shape: f32[1,128], index: 5, kind: input, shape index: {}]   ;;  %s1276_s6 = inlined_call_operand.vmem [shape: f32[1,128], index: 6, kind: input, shape index: {}]   ;;  %s1277_s7 = inlined_call_operand.hbm [shape: f32[32,128], index: 7, kind: output, shape index: {}]  }
   0x1   :  { %13 = vsyncpa [#allocation6], 0  ;;  %s32_s26 = sshll.u32 %s1271_s1, 4  ;;  %s33_s26 = int_to_ptr.hbm [resolvable:$true] %s32_s26 }
   0x2   :  { %14 = vsyncpa [#allocation4], 0  ;;  %s1066_s27 = smov [#allocation5]   ;;  %s19_s8 = sshll.u32 %s1270_s0, 4  ;;  %s20_s8 = int_to_ptr.hbm [resolvable:$true] %s19_s8 }
   0x3   :  { %s34_s28 = sshll.u32 %s1066_s27, 4  ;;  %s1067_s9 = smov 64   ;;  %s35_s28 = int_to_ptr.vmem [resolvable:$true] %s34_s28 }
   0x4   :  { %s1068_s10 = smov 4   ;;  %s1069_s11 = smov [#allocation2]  }
   0x5   :  { %40 = dma.hbm_to_vmem [thread:$0]  %s33_s26, 1536, %s35_s28, [#allocation6], %s1067_s9, %s1067_s9, %s1068_s10  }
   0x6   :  { %s21_s12 = sshll.u32 %s1069_s11, 4  ;;  %s1070_s13 = smov 128   ;;  %s22_s12 = int_to_ptr.vmem [resolvable:$true] %s21_s12 }
   0x7   :  { %s1071_s1 = smov 8   ;;  %s49_s16 = sshll.u32 %s1274_s4, 4  ;;  %s50_s16 = int_to_ptr.hbm [resolvable:$true] %s49_s16 }
   0x8   :  { %27 = dma.hbm_to_vmem [thread:$0]  %s20_s8, 512, %s22_s12, [#allocation3], %s1070_s13, %s1070_s13, %s1071_s1  }
   0x9   :  { %s1072_s0 = smov [#allocation7]  }
   0xa   :  { %s51_s17 = sshll.u32 %s1072_s0, 4  ;;  %s52_s17 = int_to_ptr.vmem [resolvable:$true] %s51_s17 }
   0xb   :  { %57 = dma.hbm_to_vmem [thread:$0]  %s50_s16, 3072, %s52_s17, [#allocation6], %s1067_s9, %s1067_s9, %s1068_s10  }
   0xc   :  { %1060 = dma.done.wait [#allocation3], 512  }
   0xd   :  { %1061 = vsyncadd [#allocation3], 4294966784 }
   0xe   :  { %1062 = dma.done.wait [#allocation6], 4608  }
   0xf   :  { %1063 = vsyncadd [#allocation6], 4294962688  ;;  %v127_v0 = vlaneseq  ;;  %vm1073_vm0 = vmmov 0   ;;  %v1074_v4 = vmov 0   ;;  %v77_v6 = vld [vmem:[#allocation2] sm:$0xff]  ;;  %v78_v7 = vld [vmem:[#allocation2 + $0x8] sm:$0xff] }
  0x10   :  { %vm185_vm1 = vmpackc.low %vm1073_vm0, %vm1073_vm0  ;;  %v79_v8 = vld [vmem:[#allocation2 + $0x10] sm:$0xff]  ;;  %v81_v9 = vpack.c.bf16 %v77_v6, %v77_v6  ;;  %v82_v10 = vpack.c.bf16 %v78_v7, %v78_v7  ;;  %v80_v11 = vld [vmem:[#allocation2 + $0x18] sm:$0xff]  ;;  %v1146_v25 = vunpack.c.l.b16 %v1074_v4  ;;  %v1154_v29 = vunpack.c.h.b16 %v1074_v4  ;;  %s746_s25 = sshll.u32 %s1277_s7, 4  ;;  %s747_s25 = int_to_ptr.hbm [resolvable:$true] %s746_s25 }
  0x11   :  { %v1132_v1 = vshrl.u32 %v127_v0, 7  ;;  %v189_v5 = vsel %vm185_vm1, 65537, %v1074_v4  ;;  %v83_v12 = vpack.c.bf16 %v79_v8, %v79_v8  ;;  %v921_v13 = vld [vmem:[#allocation5 + $0x38] sm:$0xff]  ;;  %v84_v15 = vpack.c.bf16 %v80_v11, %v80_v11  ;;  %v920_v21 = vld [vmem:[#allocation5 + $0x30] sm:$0xff]  ;;  %v919_v33 = vld [vmem:[#allocation5 + $0x28] sm:$0xff] }
  0x12   :  { %v925_v16 = vld [vmem:[#allocation5 + $0x58] sm:$0xff]  ;;  %v193_v17 = vunpack.c.l.b16 %v189_v5  ;;  %v89_v18 = vunpack.c.l.b16 %v81_v9  ;;  %v90_v19 = vunpack.c.l.b16 %v82_v10  ;;  %363 = vmatpush.bf16.msra.mxu0 %v921_v13  ;;  %v924_v23 = vld [vmem:[#allocation5 + $0x50] sm:$0xff]  ;;  %v923_v35 = vld [vmem:[#allocation5 + $0x48] sm:$0xff]  ;;  %vm116_vm4 = vsmask.f32 7424 }
  0x13   :  { %v129_v2 = vadd.s32 8, %v1132_v1  ;;  %v91_v20 = vunpack.c.l.b16 %v83_v12  ;;  %v92_v22 = vunpack.c.l.b16 %v84_v15  ;;  %386 = vmatpush.bf16.msra.mxu1 %v925_v16  ;;  %v918_v39 = vld [vmem:[#allocation5 + $0x20] sm:$0xff]  ;;  %v917_v44 = vld [vmem:[#allocation5 + $0x18] sm:$0xff]  ;;  %vm252_vm8 = vcmask 523264   ;;  %v916_v46 = vld [vmem:[#allocation5 + $0x10] sm:$0xff] }
  0x14   :  { %v1143_v24 = vpack.c.b16 %v90_v19, %v89_v18  ;;  %v1151_v28 = vunpack.i.l.s16 %v193_v17  ;;  %v922_v41 = vld [vmem:[#allocation5 + $0x40] sm:$0xff]  ;;  %v915_v47 = vld [vmem:[#allocation5 + $0x8] sm:$0xff]  ;;  %v131_v49 = vadd.s32 24, %v1132_v1  ;;  %vm124_vm11 = vcmask 1047552   ;;  %v941_v7 = vld [vmem:[#allocation7 + $0x78] sm:$0xff] }
  0x15   :  { %v143_v3 = vand.u32 15, %v129_v2  ;;  %v1149_v27 = vpack.c.b16 %v92_v22, %v91_v20  ;;  %v914_v48 = vld [vmem:[#allocation5] sm:$0xff]  ;;  %v136_v53 = vand.u32 15, %v1132_v1  ;;  %vm1184_vm12 = vmand %vm124_vm11, %vm116_vm4  ;;  %v130_v62 = vadd.s32 16, %v1132_v1  ;;  %678 = vmatpush.bf16.msra.mxu3 %v941_v7  ;;  %v940_v1 = vld [vmem:[#allocation7 + $0x70] sm:$0xff] }
  0x16   :  { %248 = vrot.lane.b32.xlu0 %v1143_v24, %s1067_s9  ;;  %v97_v31 = vshrl.u32 %v1143_v24, 16  ;;  %v100_v32 = vshll.u32 %v1143_v24, 16  ;;  %364 = vmatpush.bf16.msra.mxu0 %v920_v21  ;;  %vm236_vm5 = vcmp.ne.s32.totalorder %v1151_v28, %v1146_v25  ;;  %v157_v50 = vand.u32 15, %v131_v49  ;;  %v933_v22 = vld [vmem:[#allocation7 + $0x38] sm:$0xff]  ;;  %v932_v24 = vld [vmem:[#allocation7 + $0x30] sm:$0xff] }
  0x17   :  { %vm1136_vm2 = vcmp.eq.s32.totalorder %v143_v3, 15  ;;  %v107_v34 = vshll.u32 %v1149_v27, 16  ;;  %387 = vmatpush.bf16.msra.mxu1 %v924_v23  ;;  %v104_v51 = vshrl.u32 %v1149_v27, 16  ;;  %vm180_vm13 = vcmp.eq.s32.totalorder %v136_v53, 0  ;;  %v939_v23 = vld [vmem:[#allocation7 + $0x68] sm:$0xff]  ;;  %659 = vmatpush.bf16.msra.mxu2 %v933_v22 }
  0x18   :  { %vm219_vm3 = vmpackc.low %vm1136_vm2, %vm1136_vm2  ;;  %v117_v37 = vrot.slane %v100_v32, 1  ;;  %vm217_vm9 = vcmp.eq.s32.totalorder %v157_v50, 15  ;;  %v150_v0 = vand.u32 15, %v130_v62  ;;  %v99_v2 = vrot.slane %v97_v31, 7  ;;  %v961_v49 = vld [vmem:[%s1273_s3] ss:$0 sm:$0xff] }
  0x19   :  { %v223_v26 = vsel %vm219_vm3, 65537, %v1074_v4  ;;  %v119_v38 = vrot.slane %v107_v34, 1  ;;  %vm221_vm10 = vmpackc.low %vm217_vm9, %vm217_vm9  ;;  %vm95_vm1 = vsmask.f32 256  ;;  %vm113_vm2 = vcmask 1040384   ;;  %679 = vmatpush.bf16.msra.mxu3 %v940_v1 }
  0x1a   :  { %v227_v30 = vunpack.c.l.b16 %v223_v26  ;;  %365 = vmatpush.bf16.msra.mxu0 %v919_v33  ;;  %v118_v40 = vor.u32 %v117_v37, %v97_v31  ;;  %v225_v52 = vsel %vm221_vm10, 65537, %v1074_v4  ;;  %vm184_vm0 = vmpackc.low %vm180_vm13, %vm180_vm13  ;;  %vm182_vm3 = vcmp.eq.s32.totalorder %v150_v0, 0  ;;  %v931_v26 = vld [vmem:[#allocation7 + $0x28] sm:$0xff]  ;;  %v929_v31 = vld [vmem:[#allocation7 + $0x18] sm:$0xff] }
  0x1b   :  { %388 = vmatpush.bf16.msra.mxu1 %v923_v35  ;;  %v229_v55 = vunpack.c.l.b16 %v225_v52  ;;  %v121_v56 = vor.u32 %v119_v38, %v104_v51  ;;  %v188_v61 = vsel %vm184_vm0, 65537, %v1074_v4  ;;  %v102_v5 = vor.u32 %v100_v32, %v99_v2  ;;  %vm186_vm10 = vmpackc.low %vm182_vm3, %vm182_vm3  ;;  %660 = vmatpush.bf16.msra.mxu2 %v932_v24  ;;  %v935_v32 = vld [vmem:[#allocation7 + $0x48] sm:$0xff]  ;;  %v948_v33 = vld [vmem:[#allocation7 + $0xb0] sm:$0xff] }
  0x1c   :  { %v765_v36 = vunpack.i.l.s16 %v227_v30  ;;  %v120_v42 = vsel %vm116_vm4, %v118_v40, %v119_v38  ;;  %v192_v63 = vunpack.c.l.b16 %v188_v61  ;;  %vm203_vm9 = vcmp.ne.s32.totalorder %v1151_v28, %v1154_v29  ;;  %v930_v28 = vld [vmem:[#allocation7 + $0x20] sm:$0xff]  ;;  %v949_v30 = vld [vmem:[#allocation7 + $0xb8] sm:$0xff]  ;;  %v927_v37 = vld [vmem:[#allocation7 + $0x8] sm:$0xff] }
  0x1d   :  { %v767_v57 = vunpack.i.l.s16 %v229_v55  ;;  %v126_v58 = vsel %vm1184_vm12, %v121_v56, 0  ;;  %v190_v10 = vsel %vm186_vm10, 65537, %v1074_v4  ;;  %v106_v15 = vrot.slane %v104_v51, 7  ;;  %680 = vmatpush.bf16.msra.mxu3 %v939_v23  ;;  %v934_v35 = vld [vmem:[#allocation7 + $0x40] sm:$0xff] }
  0x1e   :  { %vm237_vm6 = vcmp.ne.s32.totalorder %v765_v36, %v1154_v29  ;;  %250 = vrot.lane.b32.xlu0 %v1149_v27, %s1067_s9  ;;  %366 = vmatpush.bf16.msra.mxu0 %v918_v39  ;;  %v760_v3 = vunpack.i.l.s16 %v192_v63  ;;  %v194_v12 = vunpack.c.l.b16 %v190_v10  ;;  %v937_v27 = vld [vmem:[#allocation7 + $0x58] sm:$0xff]  ;;  %v947_v36 = vld [vmem:[#allocation7 + $0xa8] sm:$0xff]  ;;  %v946_v38 = vld [vmem:[#allocation7 + $0xa0] sm:$0xff] }
  0x1f   :  { %vm1170_vm7 = vmpackc.low %vm237_vm6, %vm236_vm5  ;;  %389 = vmatpush.bf16.msra.mxu1 %v922_v41  ;;  %vm244_vm14 = vcmp.ne.s32.totalorder %v767_v57, %v1154_v29  ;;  %v109_v17 = vor.u32 %v107_v34, %v106_v15  ;;  %661 = vmatpush.bf16.msra.mxu2 %v931_v26  ;;  %v936_v29 = vld [vmem:[#allocation7 + $0x50] sm:$0xff]  ;;  %v926_v40 = vld [vmem:[#allocation7] sm:$0xff] }
  0x20   :  { %v246_v45 = vsel %vm1170_vm7, 0, %v120_v42  ;;  %vm1194_vm15 = vmpackc.low %vm244_vm14, %vm236_vm5  ;;  %vm202_vm6 = vcmp.ne.s32.totalorder %v760_v3, %v1146_v25  ;;  %v762_v16 = vunpack.i.l.s16 %v194_v12  ;;  %v928_v34 = vld [vmem:[#allocation7 + $0x10] sm:$0xff]  ;;  %v945_v41 = vld [vmem:[#allocation7 + $0x98] sm:$0xff] }
  0x21   :  { %v247_v60 = vsel %vm1194_vm15, 0, %v126_v58  ;;  %vm1204_vm5 = vmand %vm113_vm2, %vm95_vm1  ;;  %v110_v18 = vsel %vm95_vm1, %v99_v2, %v109_v17  ;;  %v960_v42 = vld [vmem:[%s1272_s2] ss:$0 sm:$0xff] }
  0x22   :  { %367 = vmatpush.bf16.msra.mxu0 %v917_v44  ;;  %816 = vmatmul.msk.bf16.vlgmr.msra.gmra.mxu1 %vm252_vm8, %v246_v45  ;;  %v115_v8 = vsel %vm1204_vm5, 0, %v102_v5  ;;  %vm1216_vm11 = vmpackc.low %vm203_vm9, %vm202_vm6  ;;  %vm209_vm13 = vcmp.ne.s32.totalorder %v762_v16, %v1146_v25  ;;  %v938_v25 = vld [vmem:[#allocation7 + $0x60] sm:$0xff]  ;;  %v944_v45 = vld [vmem:[#allocation7 + $0x90] sm:$0xff] }
  0x23   :  { %v212_v11 = vsel %vm1216_vm11, 0, %v115_v8  ;;  %vm1231_vm14 = vmpackc.low %vm203_vm9, %vm209_vm13  ;;  %681 = vmatpush.bf16.msra.mxu3 %v938_v25  ;;  %662 = vmatpush.bf16.msra.mxu2 %v930_v28  ;;  %v942_v52 = vld [vmem:[#allocation7 + $0x80] sm:$0xff] }
  0x24   :  { %v213_v20 = vsel %vm1231_vm14, 0, %v110_v18  ;;  %697 = vmatpush.bf16.msrb.mxu1 %v949_v30  ;;  %v962_v43 = vld [vmem:[%s1275_s5] ss:$0 sm:$0xff]  ;;  %s1075_s5 = smov [#allocation8]  }
  0x26   :  { %368 = vmatpush.bf16.msra.mxu0 %v916_v46 }
  0x27   :  { %682 = vmatpush.bf16.msra.mxu3 %v937_v27  ;;  %663 = vmatpush.bf16.msra.mxu2 %v929_v31 }
  0x28   :  { %698 = vmatpush.bf16.msrb.mxu1 %v948_v33 }
  0x2a   :  { %369 = vmatpush.bf16.msra.mxu0 %v915_v47  ;;  %v943_v47 = vld [vmem:[#allocation7 + $0x88] sm:$0xff] }
  0x2b   :  { %683 = vmatpush.bf16.msra.mxu3 %v936_v29  ;;  %664 = vmatpush.bf16.msra.mxu2 %v928_v34 }
  0x2c   :  { %699 = vmatpush.bf16.msrb.mxu1 %v947_v36 }
  0x2e   :  { %370 = vmatpush.bf16.msra.mxu0 %v914_v48 }
  0x2f   :  { %684 = vmatpush.bf16.msra.mxu3 %v935_v32  ;;  %665 = vmatpush.bf16.msra.mxu2 %v927_v37 }
  0x30   :  { %700 = vmatpush.bf16.msrb.mxu1 %v946_v38 }
  0x32   :  { %817 = vmatmul.msk.bf16.gmra.mxu1 %vm252_vm8, %v247_v60 }
  0x33   :  { %685 = vmatpush.bf16.msra.mxu3 %v934_v35  ;;  %666 = vmatpush.bf16.msra.mxu2 %v926_v40 }
  0x34   :  { %701 = vmatpush.bf16.msrb.mxu1 %v945_v41 }
  0x38   :  { %702 = vmatpush.bf16.msrb.mxu1 %v944_v45 }
  0x3c   :  { %703 = vmatpush.bf16.msrb.mxu1 %v943_v47 }
  0x40   :  { %704 = vmatpush.bf16.msrb.mxu1 %v942_v52 }
  0x88   :  { %v249_v13 = vpop.permute.xlu0 %248 }
  0x89   :  { %v255_v14 = vsel %vm252_vm8, %v212_v11, %v249_v13 }
  0x8a   :  { %371 = vmatmul.bf16.vlgmr.msra.gmra.mxu0 %v255_v14 }
  0x90   :  { %v251_v19 = vpop.permute.xlu0 %250 }
  0x91   :  { %v259_v21 = vsel %vm252_vm8, %v213_v20, %v251_v19 }
  0x9a   :  { %376 = vmatmul.bf16.gmra.mxu0 %v259_v21 }
  0x9f   :  { %v391_v39 = vpop.f32.mrf.mxu1 }
  0xa7   :  { %v393_v50 = vpop.f32.mrf.mxu1 }
  0xaf   :  { %v396_v60 = vpop.f32.mrf.mxu1 }
  0xb7   :  { %v398_v11 = vpop.f32.mrf.mxu1 }
 0x107   :  { %v372_v44 = vpop.f32.mrf.mxu0 }
 0x108   :  { %v392_v46 = vadd.f32 %v391_v39, %v372_v44 }
 0x10a   :  { %v405_v48 = vmul.f32 %v960_v42, %v392_v46  ;;  %v963_v46 = vld [vmem:[%s1276_s6] ss:$0 sm:$0xff]  ;;  %s744_s6 = sshll.u32 %s1075_s5, 4  ;;  %s745_s6 = int_to_ptr.vmem [resolvable:$true] %s744_s6 }
 0x10c   :  { %v413_v51 = vadd.f32 %v961_v49, %v405_v48 }
 0x10e   :  { %v417_v56 = vmax.f32 %v413_v51, 0.0 }
 0x10f   :  { %v374_v53 = vpop.f32.mrf.mxu0 }
 0x110   :  { %v394_v55 = vadd.f32 %v393_v50, %v374_v53  ;;  %v421_v61 = vpack.c.bf16 %v417_v56, %v417_v56 }
 0x112   :  { %v406_v57 = vmul.f32 %v960_v42, %v394_v55  ;;  %v429_v5 = vunpack.c.l.b16 %v421_v61 }
 0x114   :  { %v414_v58 = vadd.f32 %v961_v49, %v406_v57 }
 0x116   :  { %v418_v62 = vmax.f32 %v414_v58, 0.0 }
 0x117   :  { %v377_v63 = vpop.f32.mrf.mxu0 }
 0x118   :  { %v422_v0 = vpack.c.bf16 %v418_v62, %v418_v62  ;;  %v397_v2 = vadd.f32 %v396_v60, %v377_v63 }
 0x11a   :  { %v407_v3 = vmul.f32 %v960_v42, %v397_v2  ;;  %v430_v7 = vunpack.c.l.b16 %v422_v0 }
 0x11c   :  { %v433_v1 = vpack.c.b16 %v430_v7, %v429_v5  ;;  %v415_v8 = vadd.f32 %v961_v49, %v407_v3 }
 0x11e   :  { %686 = vmatmul.bf16.vlgmr.msra.gmra.mxu3 %v433_v1  ;;  %v436_v10 = vshrl.u32 %v433_v1, 16  ;;  %v439_v15 = vshll.u32 %v433_v1, 16  ;;  %v419_v16 = vmax.f32 %v415_v8, 0.0 }
 0x11f   :  { %v379_v12 = vpop.f32.mrf.mxu0 }
 0x120   :  { %v399_v13 = vadd.f32 %v398_v11, %v379_v12  ;;  %v438_v14 = vrot.slane %v436_v10, 7  ;;  %v423_v22 = vpack.c.bf16 %v419_v16, %v419_v16  ;;  %v453_v27 = vrot.slane %v439_v15, 1 }
 0x122   :  { %v408_v17 = vmul.f32 %v960_v42, %v399_v13  ;;  %v441_v18 = vor.u32 %v439_v15, %v438_v14  ;;  %v431_v25 = vunpack.c.l.b16 %v423_v22  ;;  %v454_v31 = vor.u32 %v453_v27, %v436_v10 }
 0x124   :  { %v416_v19 = vadd.f32 %v961_v49, %v408_v17  ;;  %v452_v20 = vsel %vm1204_vm5, 0, %v441_v18 }
 0x125   :  { %v461_v21 = vsel %vm1216_vm11, 0, %v452_v20 }
 0x126   :  { %v420_v23 = vmax.f32 %v416_v19, 0.0  ;;  %667 = vmatmul.bf16.vlgmr.msra.gmra.mxu2 %v461_v21 }
 0x128   :  { %v424_v24 = vpack.c.bf16 %v420_v23, %v420_v23 }
 0x12a   :  { %v432_v26 = vunpack.c.l.b16 %v424_v24 }
 0x12c   :  { %v434_v28 = vpack.c.b16 %v432_v26, %v431_v25 }
 0x12e   :  { %v443_v29 = vshrl.u32 %v434_v28, 16  ;;  %v446_v30 = vshll.u32 %v434_v28, 16  ;;  %691 = vmatmul.bf16.gmra.mxu3 %v434_v28 }
 0x130   :  { %v455_v32 = vrot.slane %v446_v30, 1  ;;  %v445_v33 = vrot.slane %v443_v29, 7 }
 0x132   :  { %v456_v6 = vsel %vm116_vm4, %v454_v31, %v455_v32  ;;  %v448_v34 = vor.u32 %v446_v30, %v445_v33  ;;  %v457_v37 = vor.u32 %v455_v32, %v443_v29 }
 0x133   :  { %v463_v9 = vsel %vm1170_vm7, 0, %v456_v6 }
 0x134   :  { %705 = vmatmul.bf16.vlgmr.msrb.gmra.mxu1 %v463_v9  ;;  %v449_v35 = vsel %vm95_vm1, %v438_v14, %v448_v34  ;;  %v460_v38 = vsel %vm1184_vm12, %v457_v37, 0 }
 0x135   :  { %v462_v36 = vsel %vm1231_vm14, 0, %v449_v35  ;;  %v464_v39 = vsel %vm1194_vm15, 0, %v460_v38 }
 0x136   :  { %672 = vmatmul.bf16.gmra.mxu2 %v462_v36 }
 0x144   :  { %710 = vmatmul.bf16.gmra.mxu1 %v464_v39 }
 0x1a1   :  { %v687_v41 = vpop.f32.mrf.mxu3 }
 0x1a9   :  { %v668_v40 = vpop.f32.mrf.mxu2  ;;  %v689_v54 = vpop.f32.mrf.mxu3 }
 0x1aa   :  { %v688_v42 = vadd.f32 %v687_v41, %v668_v40 }
 0x1b1   :  { %v670_v44 = vpop.f32.mrf.mxu2  ;;  %v706_v45 = vpop.f32.mrf.mxu1 }
 0x1b2   :  { %v707_v4 = vadd.f32 %v706_v45, %v688_v42  ;;  %v690_v59 = vadd.f32 %v689_v54, %v670_v44  ;;  %v692_v55 = vpop.f32.mrf.mxu3 }
 0x1b4   :  { %v720_v47 = vmul.f32 %v962_v43, %v707_v4 }
 0x1b6   :  { %v728_v48 = vadd.f32 %v963_v46, %v720_v47 }
 0x1b8   :  { %v732_v49 = vmax.f32 %v728_v48, 0.0 }
 0x1b9   :  { %v708_v50 = vpop.f32.mrf.mxu1  ;;  %v673_v52 = vpop.f32.mrf.mxu2 }
 0x1ba   :  { %736 = vst [vmem:[#allocation8] sm:$0xff] %v732_v49  ;;  %v709_v51 = vadd.f32 %v708_v50, %v690_v59  ;;  %v693_v57 = vadd.f32 %v692_v55, %v673_v52  ;;  %v694_v2 = vpop.f32.mrf.mxu3 }
 0x1bc   :  { %v721_v53 = vmul.f32 %v962_v43, %v709_v51 }
 0x1be   :  { %v729_v56 = vadd.f32 %v963_v46, %v721_v53 }
 0x1c0   :  { %v733_v58 = vmax.f32 %v729_v56, 0.0 }
 0x1c1   :  { %v711_v60 = vpop.f32.mrf.mxu1  ;;  %v675_v63 = vpop.f32.mrf.mxu2 }
 0x1c2   :  { %737 = vst [vmem:[#allocation8 + $0x8] sm:$0xff] %v733_v58  ;;  %v712_v61 = vadd.f32 %v711_v60, %v693_v57  ;;  %v695_v3 = vadd.f32 %v694_v2, %v675_v63 }
 0x1c4   :  { %v722_v62 = vmul.f32 %v962_v43, %v712_v61 }
 0x1c6   :  { %v730_v0 = vadd.f32 %v963_v46, %v722_v62 }
 0x1c8   :  { %v734_v5 = vmax.f32 %v730_v0, 0.0 }
 0x1c9   :  { %v713_v7 = vpop.f32.mrf.mxu1 }
 0x1ca   :  { %738 = vst [vmem:[#allocation8 + $0x10] sm:$0xff] %v734_v5  ;;  %v714_v1 = vadd.f32 %v713_v7, %v695_v3 }
 0x1cc   :  { %v723_v8 = vmul.f32 %v962_v43, %v714_v1 }
 0x1ce   :  { %v731_v10 = vadd.f32 %v963_v46, %v723_v8 }
 0x1d0   :  { %v735_v11 = vmax.f32 %v731_v10, 0.0 }
 0x1d2   :  { %739 = vst [vmem:[#allocation8 + $0x18] sm:$0xff] %v735_v11 }
 0x1d3   :  { %752 = dma.vmem_to_hbm [thread:$0]  %s745_s6, 512, %s747_s25, [#allocation4], %s1070_s13, %s1070_s13, %s1071_s1  }
 0x1d4   :  { %1064 = dma.done.wait [#allocation4], 512  }
 0x1d5   :  { %1065 = vsyncadd [#allocation4], 4294966784 }
 0x1d6   :  { %757 = vsyncpa [#allocation3], 1 }
 0x1d7   :  { %758 = vsyncpa [#allocation6], 1 }
 0x1d8   :  { %759 = vsyncpa [#allocation4], 1 }

</bundles_post_ra>
